<compile_context>
chip_gen: v7x
topology: tpu7x:2x2x1
jax: 0.10.0
libtpu: 0.0.40
codegen_flags: <defaults>
</compile_context>

<pallas_src>
from itertools import combinations

import numpy as np
import jax
import jax.numpy as jnp
from jax.experimental import pallas as pl
from jax.experimental.pallas import tpu as pltpu


# --------------------------------------------------------------------------- #
# Pallas kernel: per-triplet  (||e_a - e_p||^2 < ||e_a - e_n||^2)
# --------------------------------------------------------------------------- #
def _triplet_accuracy_kernel(trip_ref, emb_ref, out_ref):
    # trip_ref : (TILE, 3) int32   -- (anchor, positive, negative) indices
    # emb_ref  : (N, D)            -- full embedding table, resident in VMEM
    # out_ref  : (TILE, 1) int32   -- 1 if ap_dist < an_dist else 0
    emb = emb_ref[...]                       # native dtype (f32 / bf16)
    n_rows = emb.shape[0]
    tile = trip_ref.shape[0]

    a_idx = trip_ref[:, 0:1]                 # (TILE, 1) int32
    p_idx = trip_ref[:, 1:2]
    n_idx = trip_ref[:, 2:3]

    # One-hot row selectors; gather-as-matmul on the MXU (exact: 1.0 * x + 0s).
    row_ids = jax.lax.broadcasted_iota(jnp.int32, (tile, n_rows), 1)
    sel_a = (row_ids == a_idx).astype(emb.dtype)      # (TILE, N)
    sel_p = (row_ids == p_idx).astype(emb.dtype)
    sel_n = (row_ids == n_idx).astype(emb.dtype)

    ea = jnp.dot(sel_a, emb, preferred_element_type=jnp.float32)   # (TILE, D) f32
    ep = jnp.dot(sel_p, emb, preferred_element_type=jnp.float32)
    en = jnp.dot(sel_n, emb, preferred_element_type=jnp.float32)

    d_ap = ea - ep
    d_an = ea - en
    ap = jnp.sum(d_ap * d_ap, axis=1, keepdims=True)  # (TILE, 1) f32
    an = jnp.sum(d_an * d_an, axis=1, keepdims=True)

    out_ref[...] = (ap < an).astype(jnp.int32)


def triplet_accuracy_from_triplets(embeddings, triplets, *, tile=128):
    """Pallas TPU forward given already-mined triplets. Returns bool (T,)."""
    assert embeddings.ndim == 2 and triplets.ndim == 2 and triplets.shape[1] == 3
    N, D = embeddings.shape
    T = int(triplets.shape[0])
    if T == 0:
        return jnp.zeros((0,), dtype=jnp.bool_)

    num_tiles = pl.cdiv(T, tile)
    T_pad = num_tiles * tile

    trip = jnp.asarray(triplets, dtype=jnp.int32)
    if T_pad != T:
        trip = jnp.pad(trip, ((0, T_pad - T), (0, 0)))  # padded rows -> (0,0,0)

    out = pl.pallas_call(
        _triplet_accuracy_kernel,
        out_shape=jax.ShapeDtypeStruct((T_pad, 1), jnp.int32),
        grid_spec=pltpu.PrefetchScalarGridSpec(
            num_scalar_prefetch=0,
            grid=(num_tiles,),
            in_specs=[
                pl.BlockSpec((tile, 3), lambda i: (i, 0)),   # triplet index tile
                pl.BlockSpec((N, D), lambda i: (0, 0)),      # embeddings (resident)
            ],
            out_specs=pl.BlockSpec((tile, 1), lambda i: (i, 0)),
        ),
        compiler_params=pltpu.CompilerParams(
            dimension_semantics=("parallel",),               # independent tiles
        ),
    )(trip, embeddings)

    return out[:T, 0].astype(jnp.bool_)


# --------------------------------------------------------------------------- #
# Host-side triplet selector (AllTripletSelector-style) + module wrapper
# --------------------------------------------------------------------------- #
def all_triplet_selector(embeddings, target):
    """All (anchor, positive, negative) triplets per class. Host-side numpy."""
    labels = np.asarray(target)
    triplets = []
    for lbl in np.unique(labels):
        mask = labels == lbl
        pos_idx = np.where(mask)[0]
        if len(pos_idx) < 2:
            continue
        neg_idx = np.where(~mask)[0]
        for a, p in combinations(pos_idx, 2):
            for n in neg_idx:
                triplets.append((a, p, n))
    if not triplets:
        return np.zeros((0, 3), dtype=np.int32)
    return np.asarray(triplets, dtype=np.int32)


class OnlineTripletAccuracy:
    """Mirror of the PyTorch module: selector on host, distance math on TPU."""

    def __init__(self, triplet_selector=all_triplet_selector):
        self.triplet_selector = triplet_selector

    def __call__(self, embeddings, target):
        triplets = self.triplet_selector(embeddings, target)
        return triplet_accuracy_from_triplets(embeddings, jnp.asarray(triplets))


# --------------------------------------------------------------------------- #
# Reference + test
# --------------------------------------------------------------------------- #
def _reference(embeddings, triplets):
    ea = embeddings[triplets[:, 0]]
    ep = embeddings[triplets[:, 1]]
    en = embeddings[triplets[:, 2]]
    ap = jnp.sum((ea - ep) ** 2, axis=1)
    an = jnp.sum((ea - en) ** 2, axis=1)
    return ap < an


if __name__ == "__main__":
    key = jax.random.PRNGKey(0)

    N, D, n_classes = 16, 32, 4
    labels = np.arange(N) % n_classes                     # deterministic labels
    embeddings = jax.random.normal(key, (N, D), dtype=jnp.float32)

    module = OnlineTripletAccuracy(all_triplet_selector)
    result = module(embeddings, labels)                   # bool (T,)
    result = jax.block_until_ready(result)

    triplets = jnp.asarray(all_triplet_selector(embeddings, labels))
    ref = _reference(embeddings, triplets)

    assert result.shape == ref.shape, (result.shape, ref.shape)
    assert bool(jnp.array_equal(result, ref)), "mismatch vs reference"

    print("KERNEL_OK")
</pallas_src>

<mosaic_0001>
module attributes {stable_mosaic.version = 11 : i64} {
  func.func @_triplet_accuracy_kernel(%arg0: i32, %arg1: memref<128x3xi32, #tpu.memory_space<vmem>>, %arg2: memref<16x32xf32, #tpu.memory_space<vmem>>, %arg3: memref<128x1xi32, #tpu.memory_space<vmem>>) attributes {dimension_semantics = [#tpu.dimension_semantics<parallel>], iteration_bounds = array<i64: 3>, scalar_prefetch = 0 : i64, scratch_operands = 0 : i64, tpu.core_type = #tpu.core_type<tc>, window_params = [{transform_indices = @transform_0, window_bounds = array<i64: 128, 3>}, {pipeline_mode = #tpu.pipeline_mode<synchronous>, transform_indices = @transform_1, window_bounds = array<i64: 16, 32>}, {transform_indices = @transform_2, window_bounds = array<i64: 128, 1>}]} {
    %c0 = arith.constant 0 : index
    %c0_0 = arith.constant 0 : index
    %0 = vector.load %arg2[%c0, %c0_0] : memref<16x32xf32, #tpu.memory_space<vmem>>, vector<16x32xf32>
    %c0_1 = arith.constant 0 : index
    %c0_2 = arith.constant 0 : index
    %1 = vector.load %arg1[%c0_1, %c0_2] : memref<128x3xi32, #tpu.memory_space<vmem>>, vector<128x1xi32>
    %c0_3 = arith.constant 0 : index
    %c1 = arith.constant 1 : index
    %2 = vector.load %arg1[%c0_3, %c1] : memref<128x3xi32, #tpu.memory_space<vmem>>, vector<128x1xi32>
    %c0_4 = arith.constant 0 : index
    %c2 = arith.constant 2 : index
    %3 = vector.load %arg1[%c0_4, %c2] : memref<128x3xi32, #tpu.memory_space<vmem>>, vector<128x1xi32>
    %4 = tpu.iota {dimensions = array<i32: 1>} : vector<128x16xi32>
    %5 = vector.broadcast %1 : vector<128x1xi32> to vector<128x16xi32>
    %6 = arith.cmpi eq, %4, %5 : vector<128x16xi32>
    %7 = arith.extui %6 : vector<128x16xi1> to vector<128x16xi32>
    %8 = arith.sitofp %7 : vector<128x16xi32> to vector<128x16xf32>
    %9 = vector.broadcast %2 : vector<128x1xi32> to vector<128x16xi32>
    %10 = arith.cmpi eq, %4, %9 : vector<128x16xi32>
    %11 = arith.extui %10 : vector<128x16xi1> to vector<128x16xi32>
    %12 = arith.sitofp %11 : vector<128x16xi32> to vector<128x16xf32>
    %13 = vector.broadcast %3 : vector<128x1xi32> to vector<128x16xi32>
    %14 = arith.cmpi eq, %4, %13 : vector<128x16xi32>
    %15 = arith.extui %14 : vector<128x16xi1> to vector<128x16xi32>
    %16 = arith.sitofp %15 : vector<128x16xi32> to vector<128x16xf32>
    %cst = arith.constant dense<0.000000e+00> : vector<128x32xf32>
    %17 = tpu.matmul %8, %0, %cst {dimension_numbers = #tpu.dot_dimension_numbers<[1], [0], [0], [1], [0, 0, 1, 1], [], []>} : vector<128x16xf32>, vector<16x32xf32>, vector<128x32xf32> -> vector<128x32xf32>
    %cst_5 = arith.constant dense<0.000000e+00> : vector<128x32xf32>
    %18 = tpu.matmul %12, %0, %cst_5 {dimension_numbers = #tpu.dot_dimension_numbers<[1], [0], [0], [1], [0, 0, 1, 1], [], []>} : vector<128x16xf32>, vector<16x32xf32>, vector<128x32xf32> -> vector<128x32xf32>
    %cst_6 = arith.constant dense<0.000000e+00> : vector<128x32xf32>
    %19 = tpu.matmul %16, %0, %cst_6 {dimension_numbers = #tpu.dot_dimension_numbers<[1], [0], [0], [1], [0, 0, 1, 1], [], []>} : vector<128x16xf32>, vector<16x32xf32>, vector<128x32xf32> -> vector<128x32xf32>
    %20 = arith.subf %17, %18 : vector<128x32xf32>
    %21 = arith.subf %17, %19 : vector<128x32xf32>
    %22 = arith.mulf %20, %20 : vector<128x32xf32>
    %cst_7 = arith.constant dense<0.000000e+00> : vector<128xf32>
    %23 = vector.multi_reduction <add>, %22, %cst_7 [1] : vector<128x32xf32> to vector<128xf32>
    %24 = vector.shape_cast %23 : vector<128xf32> to vector<128x1xf32>
    %25 = arith.mulf %21, %21 : vector<128x32xf32>
    %cst_8 = arith.constant dense<0.000000e+00> : vector<128xf32>
    %26 = vector.multi_reduction <add>, %25, %cst_8 [1] : vector<128x32xf32> to vector<128xf32>
    %27 = vector.shape_cast %26 : vector<128xf32> to vector<128x1xf32>
    %28 = arith.cmpf olt, %24, %27 : vector<128x1xf32>
    %29 = arith.extui %28 : vector<128x1xi1> to vector<128x1xi32>
    %c0_9 = arith.constant 0 : index
    %c0_10 = arith.constant 0 : index
    %30 = vector.load %arg3[%c0_9, %c0_10] : memref<128x1xi32, #tpu.memory_space<vmem>>, vector<128x1xi32>
    tpu.vector_store %arg3[%c0_9, %c0_10], %29 {strides = array<i32>} : memref<128x1xi32, #tpu.memory_space<vmem>>, vector<128x1xi32>,
    return
  }
  func.func @transform_0(%arg0: i32) -> (i32, i32) {
    %c0_i32 = arith.constant 0 : i32
    %c0_i32_0 = arith.constant 0 : i32
    return %arg0, %c0_i32 : i32, i32
  }
  func.func @transform_1(%arg0: i32) -> (i32, i32) {
    %c0_i32 = arith.constant 0 : i32
    %c0_i32_0 = arith.constant 0 : i32
    %c0_i32_1 = arith.constant 0 : i32
    return %c0_i32, %c0_i32_0 : i32, i32
  }
  func.func @transform_2(%arg0: i32) -> (i32, i32) {
    %c0_i32 = arith.constant 0 : i32
    %c0_i32_0 = arith.constant 0 : i32
    return %arg0, %c0_i32 : i32, i32
  }
}

</mosaic_0001>

<bundles_post_ra>
// kernel: tpu_custom_call.1
= control target key start
LH: loop header
LB: loop body
LE: loop exit
PB: predicated region body
PF: predicated region fallthrough
CT: control target
= control target key end

     0   :  { %s1617_s9 = smov 0   ;;  %s1955_s0 = inlined_call_operand.vmem [shape: s32[384,3], index: 0, kind: input, shape index: {}]   ;;  %s1956_s1 = inlined_call_operand.vmem [shape: f32[16,32], index: 1, kind: input, shape index: {}]   ;;  %s1957_s2 = inlined_call_operand.vmem [shape: s32[384,1], index: 2, kind: output, shape index: {}]  }
   0x1 LB: > { %s1301_s10 = sadd.s32 4294967295, %s1596_s9   ;;  %p1305_p0 = scmp.ge.s32.totalorder %s1596_s9, 1  ;;  %s1596_s9 = sphi %s1617_s9, %s12_s9  }
   0x2   : > { %p113_p1 = scmp.lt.s32.totalorder %s1596_s9, 4 }
   0x4   : > { %p114_p2 = pnand %p1305_p0, %p113_p1 }
   0x5   : > { %s1306_s11 = sshll.u32 (!%p114_p2), %s1301_s10, 4  ;;  %v1598_v0 = vmov (!%p114_p2), 0   ;;  %v147_v1 = vld [vmem:[%s1956_s1] sm:$0xff] (!%p114_p2)  ;;  %v148_v2 = vld [vmem:[%s1956_s1 + $0x8] sm:$0xff] (!%p114_p2)  ;;  %v1599_v20 = vmov (!%p114_p2), 2   ;;  %v1600_v21 = vmov (!%p114_p2), 1   ;;  %v165_v22 = vlaneseq (!%p114_p2) }
   0x6   : > { %117 = sbr.rel (%p114_p2) target bundleno = 633 (0x279), region = 28  ;;  %1573 = vset.pattern.permute.xlu1 (!%p114_p2), %v1598_v0  ;;  %1572 = vset.pattern.permute.xlu0 (!%p114_p2), %v1598_v0  ;;  %p136_p3 = scmp.lt.s32.totalorder (!%p114_p2), %s1306_s11, 47  ;;  %v1635_v3 = vpack.c.bf16 (!%p114_p2), %v148_v2, %v147_v1  ;;  %vm455_vm0 = vcmask (!%p114_p2), 130048   ;;  %v1601_v26 = vmov (!%p114_p2), 0.0  }
   0x7   : > { %v1677_v23 = vand.u32 (!%p114_p2), 127, %v165_v22 }
   0x8   : > { %1547 = vmatprep.subr.bf16.mxu0 (!%p114_p2), %v1635_v3  ;;  %1558 = vmatprep.subr.bf16.mxu1 (!%p114_p2), %v1635_v3 }
   0x9   : > { %1549 = vmatpush3.bf16.msra.mxu0 (!%p114_p2), %v1635_v3  ;;  %1559 = vmatpush3.bf16.msra.mxu1 (!%p114_p2), %v1635_v3 }
   0xa   : > { %1555 = vmatprep.subr.bf16.mxu0 (!%p114_p2), %v1635_v3  ;;  %1551 = vmatprep.subr.bf16.mxu1 (!%p114_p2), %v1635_v3 }
   0xd   : > { %s1959_s11 = smov (!%p136_p3, %s1306_s11), 47 }
   0xe   : > { %s1307_s16 = sshll.u32 %s1959_s11, 3 }
   0xf   : > { %s1643_s19 = scalar_lea.vmem %s1955_s0, %s1307_s16  ;;  %s1902_s22 = scalar_lea.vmem %s1957_s2, %s1307_s16 }
  0x10   : > { %v150_v4 = vld [vmem:[%s1643_s19 + $0x8] sm:$0xff]  ;;  %v149_v5 = vld [vmem:[%s1643_s19] sm:$0xff]  ;;  %v159_v8 = vld [vmem:[%s1643_s19 + $0x50] sm:$0xff] }
  0x11   : > { %171 = vperm.xlu1 %1573, %v150_v4   ;;  %168 = vperm.xlu0 %1572, %v149_v5   ;;  %v1652_v6 = vld [vmem:[%s1643_s19 + $0x48] sm:$0xff]  ;;  %v1655_v7 = vld [vmem:[%s1643_s19 + $0x40] sm:$0xff]  ;;  %v151_v9 = vld [vmem:[%s1643_s19 + $0x10] sm:$0xff] }
  0x12   : > { %v160_v10 = vld [vmem:[%s1643_s19 + $0x58] sm:$0xff]  ;;  %v161_v12 = vld [vmem:[%s1643_s19 + $0x60] sm:$0xff]  ;;  %v162_v14 = vld [vmem:[%s1643_s19 + $0x68] sm:$0xff] }
  0x13   : > { %v152_v11 = vld [vmem:[%s1643_s19 + $0x18] sm:$0xff]  ;;  %v153_v13 = vld [vmem:[%s1643_s19 + $0x20] sm:$0xff]  ;;  %v154_v15 = vld [vmem:[%s1643_s19 + $0x28] sm:$0xff] }
  0x14   : > { %v163_v16 = vld [vmem:[%s1643_s19 + $0x70] sm:$0xff]  ;;  %v164_v18 = vld [vmem:[%s1643_s19 + $0x78] sm:$0xff] }
  0x15   : > { %195 = vperm.xlu1 %1573, %v1652_v6   ;;  %192 = vperm.xlu0 %1572, %v1655_v7   ;;  %v155_v17 = vld [vmem:[%s1643_s19 + $0x30] sm:$0xff]  ;;  %v156_v19 = vld [vmem:[%s1643_s19 + $0x38] sm:$0xff] }
  0x19   : > { %198 = vperm.xlu1 %1573, %v159_v8   ;;  %174 = vperm.xlu0 %1572, %v151_v9  }
  0x1d   : > { %201 = vperm.xlu1 %1573, %v160_v10   ;;  %177 = vperm.xlu0 %1572, %v152_v11  }
  0x21   : > { %204 = vperm.xlu1 %1573, %v161_v12   ;;  %180 = vperm.xlu0 %1572, %v153_v13  }
  0x25   : > { %207 = vperm.xlu1 %1573, %v162_v14   ;;  %183 = vperm.xlu0 %1572, %v154_v15  }
  0x29   : > { %210 = vperm.xlu1 %1573, %v163_v16   ;;  %186 = vperm.xlu0 %1572, %v155_v17  }
  0x2d   : > { %213 = vperm.xlu1 %1573, %v164_v18   ;;  %189 = vperm.xlu0 %1572, %v156_v19  }
  0x31   : > { %1574 = vset.pattern.permute.xlu1 %v1599_v20  ;;  %1576 = vset.pattern.permute.xlu0 %v1599_v20 }
  0x32   : > { %360 = vperm.xlu1 %1574, %v149_v5   ;;  %363 = vperm.xlu0 %1576, %v150_v4  }
  0x36   : > { %1575 = vset.pattern.permute.xlu1 %v1600_v21  ;;  %372 = vperm.xlu0 %1576, %v153_v13  }
  0x37   : > { %267 = vperm.xlu1 %1575, %v150_v4  }
  0x3a   : > { %1579 = vset.pattern.permute.xlu0 %v1600_v21 }
  0x3b   : > { %270 = vperm.xlu1 %1575, %v151_v9   ;;  %264 = vperm.xlu0 %1579, %v149_v5  }
  0x3f   : > { %1577 = vset.pattern.permute.xlu1 %v1599_v20  ;;  %273 = vperm.xlu0 %1579, %v152_v11  }
  0x40   : > { %366 = vperm.xlu1 %1577, %v151_v9  }
  0x43   : > { %282 = vperm.xlu0 %1579, %v155_v17  }
  0x44   : > { %369 = vperm.xlu1 %1577, %v152_v11  }
  0x47   : > { %291 = vperm.xlu0 %1579, %v1652_v6  }
  0x48   : > { %1578 = vset.pattern.permute.xlu1 %v1600_v21 }
  0x49   : > { %276 = vperm.xlu1 %1578, %v153_v13  }
  0x4b   : > { %300 = vperm.xlu0 %1579, %v161_v12  }
  0x4d   : > { %279 = vperm.xlu1 %1578, %v154_v15  }
  0x4f   : > { %1585 = vset.pattern.permute.xlu0 %v1599_v20 }
  0x50   : > { %381 = vperm.xlu0 %1585, %v156_v19  }
  0x51   : > { %1580 = vset.pattern.permute.xlu1 %v1599_v20 }
  0x52   : > { %375 = vperm.xlu1 %1580, %v154_v15  }
  0x54   : > { %390 = vperm.xlu0 %1585, %v159_v8  }
  0x56   : > { %378 = vperm.xlu1 %1580, %v155_v17  }
  0x58   : > { %399 = vperm.xlu0 %1585, %v162_v14  }
  0x5a   : > { %1581 = vset.pattern.permute.xlu1 %v1600_v21 }
  0x5b   : > { %285 = vperm.xlu1 %1581, %v156_v19  }
  0x5c   : > { %1588 = vset.pattern.permute.xlu0 %v1600_v21 }
  0x5d   : > { %309 = vperm.xlu0 %1588, %v164_v18  }
  0x5f   : > { %288 = vperm.xlu1 %1581, %v1655_v7  }
  0x61   : > { %1589 = vset.pattern.permute.xlu0 %v1599_v20 }
  0x63   : > { %1582 = vset.pattern.permute.xlu1 %v1599_v20 }
  0x64   : > { %384 = vperm.xlu1 %1582, %v1655_v7  }
  0x68   : > { %387 = vperm.xlu1 %1582, %v1652_v6  }
  0x6c   : > { %1583 = vset.pattern.permute.xlu1 %v1600_v21 }
  0x6d   : > { %294 = vperm.xlu1 %1583, %v159_v8  }
  0x71   : > { %297 = vperm.xlu1 %1583, %v160_v10  }
  0x75   : > { %1584 = vset.pattern.permute.xlu1 %v1599_v20 }
  0x76   : > { %393 = vperm.xlu1 %1584, %v160_v10  }
  0x7a   : > { %396 = vperm.xlu1 %1584, %v161_v12  }
  0x7e   : > { %1586 = vset.pattern.permute.xlu1 %v1600_v21 }
  0x7f   : > { %303 = vperm.xlu1 %1586, %v162_v14  }
  0x83   : > { %306 = vperm.xlu1 %1586, %v163_v16  }
  0x87   : > { %1587 = vset.pattern.permute.xlu1 %v1599_v20 }
  0x88   : > { %402 = vperm.xlu1 %1587, %v163_v16  }
  0x8c   : > { %405 = vperm.xlu1 %1587, %v164_v18  }
  0x90   : > { %v172_v24 = vpop.permute.xlu1 %171  ;;  %v169_v25 = vpop.permute.xlu0 %168 }
  0x91   : > { %vm216_vm1 = vcmp.eq.s32.totalorder %v1677_v23, %v172_v24  ;;  %vm215_vm2 = vcmp.eq.s32.totalorder %v1677_v23, %v169_v25 }
  0x92   : > { %v1311_v27 = vsel %vm216_vm1, 1.0, %v1601_v26  ;;  %v1310_v28 = vsel %vm215_vm2, 1.0, %v1601_v26 }
  0x93   : > { %1466 = vmatprep.mubr.msk.f32.mxu0 %vm455_vm0, %v1310_v28 }
  0x94   : > { %v196_v29 = vpop.permute.xlu1 %195  ;;  %1467 = vmatmul.mubr.msk.f32.vlgmr.msra.gmra.mrb[0].mxu0 %vm455_vm0, %v1311_v27  ;;  %v193_v30 = vpop.permute.xlu0 %192 }
  0x95   : > { %vm224_vm3 = vcmp.eq.s32.totalorder %v1677_v23, %v196_v29  ;;  %vm223_vm4 = vcmp.eq.s32.totalorder %v1677_v23, %v193_v30  ;;  %1557 = vmatpush3.bf16.msra.mxu0 %v1635_v3 }
  0x96   : > { %v1319_v31 = vsel %vm224_vm3, 1.0, %v1601_v26  ;;  %v1318_v32 = vsel %vm223_vm4, 1.0, %v1601_v26 }
  0x97   : > { %1478 = vmatprep.mubr.msk.f32.mxu1 %vm455_vm0, %v1318_v32 }
  0x98   : > { %v199_v33 = vpop.permute.xlu1 %198  ;;  %1479 = vmatmul.mubr.msk.f32.vlgmr.msra.gmra.mrb[0].mxu1 %vm455_vm0, %v1319_v31  ;;  %v175_v34 = vpop.permute.xlu0 %174 }
  0x99   : > { %vm225_vm5 = vcmp.eq.s32.totalorder %v1677_v23, %v199_v33  ;;  %vm217_vm6 = vcmp.eq.s32.totalorder %v1677_v23, %v175_v34  ;;  %1553 = vmatpush3.bf16.msra.mxu1 %v1635_v3 }
  0x9a   : > { %v1320_v35 = vsel %vm225_vm5, 1.0, %v1601_v26  ;;  %v1312_v36 = vsel %vm217_vm6, 1.0, %v1601_v26 }
  0x9b   : > { %1481 = vmatprep.mubr.msk.f32.mxu1 %vm455_vm0, %v1320_v35  ;;  %1469 = vmatprep.mubr.msk.f32.mxu0 %vm455_vm0, %v1312_v36 }
  0x9c   : > { %v202_v37 = vpop.permute.xlu1 %201  ;;  %v178_v38 = vpop.permute.xlu0 %177 }
  0x9d   : > { %vm226_vm7 = vcmp.eq.s32.totalorder %v1677_v23, %v202_v37  ;;  %vm218_vm8 = vcmp.eq.s32.totalorder %v1677_v23, %v178_v38 }
  0x9e   : > { %v1321_v39 = vsel %vm226_vm7, 1.0, %v1601_v26  ;;  %v1313_v40 = vsel %vm218_vm8, 1.0, %v1601_v26 }
  0x9f   : > { %1482 = vmatmul.mubr.msk.f32.gmra.mrb[2].mxu1 %vm455_vm0, %v1321_v39  ;;  %1470 = vmatmul.mubr.msk.f32.gmra.mrb[2].mxu0 %vm455_vm0, %v1313_v40 }
  0xa0   : > { %v205_v41 = vpop.permute.xlu1 %204  ;;  %v181_v42 = vpop.permute.xlu0 %180 }
  0xa1   : > { %vm227_vm9 = vcmp.eq.s32.totalorder %v1677_v23, %v205_v41  ;;  %vm219_vm10 = vcmp.eq.s32.totalorder %v1677_v23, %v181_v42 }
  0xa2   : > { %v1322_v43 = vsel %vm227_vm9, 1.0, %v1601_v26  ;;  %v1314_v44 = vsel %vm219_vm10, 1.0, %v1601_v26 }
  0xa3   : > { %1484 = vmatprep.mubr.msk.f32.mxu1 %vm455_vm0, %v1322_v43  ;;  %1472 = vmatprep.mubr.msk.f32.mxu0 %vm455_vm0, %v1314_v44 }
  0xa4   : > { %v208_v45 = vpop.permute.xlu1 %207  ;;  %v184_v46 = vpop.permute.xlu0 %183 }
  0xa5   : > { %vm228_vm11 = vcmp.eq.s32.totalorder %v1677_v23, %v208_v45  ;;  %vm220_vm12 = vcmp.eq.s32.totalorder %v1677_v23, %v184_v46 }
  0xa6   : > { %v1323_v47 = vsel %vm228_vm11, 1.0, %v1601_v26  ;;  %v1315_v48 = vsel %vm220_vm12, 1.0, %v1601_v26 }
  0xa7   : > { %1473 = vmatmul.mubr.msk.f32.gmra.mrb[4].mxu0 %vm455_vm0, %v1315_v48  ;;  %1485 = vmatmul.mubr.msk.f32.gmra.mrb[4].mxu1 %vm455_vm0, %v1323_v47 }
  0xa8   : > { %v211_v49 = vpop.permute.xlu1 %210  ;;  %v187_v50 = vpop.permute.xlu0 %186 }
  0xa9   : > { %vm229_vm13 = vcmp.eq.s32.totalorder %v1677_v23, %v211_v49  ;;  %vm221_vm14 = vcmp.eq.s32.totalorder %v1677_v23, %v187_v50 }
  0xaa   : > { %v1324_v51 = vsel %vm229_vm13, 1.0, %v1601_v26  ;;  %v1316_v52 = vsel %vm221_vm14, 1.0, %v1601_v26 }
  0xab   : > { %1475 = vmatprep.mubr.msk.f32.mxu0 %vm455_vm0, %v1316_v52  ;;  %1487 = vmatprep.mubr.msk.f32.mxu1 %vm455_vm0, %v1324_v51 }
  0xac   : > { %v214_v53 = vpop.permute.xlu1 %213  ;;  %v190_v54 = vpop.permute.xlu0 %189 }
  0xad   : > { %vm230_vm15 = vcmp.eq.s32.totalorder %v1677_v23, %v214_v53  ;;  %vm222_vm1 = vcmp.eq.s32.totalorder %v1677_v23, %v190_v54 }
  0xae   : > { %v1325_v55 = vsel %vm230_vm15, 1.0, %v1601_v26  ;;  %v1317_v56 = vsel %vm222_vm1, 1.0, %v1601_v26 }
  0xaf   : > { %1476 = vmatmul.mubr.msk.f32.gmra.mrb[6].mxu0 %vm455_vm0, %v1317_v56  ;;  %1488 = vmatmul.mubr.msk.f32.gmra.mrb[6].mxu1 %vm455_vm0, %v1325_v55 }
  0xb1   : > { %v361_v57 = vpop.permute.xlu1 %360  ;;  %v364_v58 = vpop.permute.xlu0 %363 }
  0xb2   : > { %vm407_vm2 = vcmp.eq.s32.totalorder %v1677_v23, %v361_v57  ;;  %vm408_vm3 = vcmp.eq.s32.totalorder %v1677_v23, %v364_v58 }
  0xb3   : > { %v1342_v59 = vsel %vm407_vm2, 1.0, %v1601_v26  ;;  %v1343_v60 = vsel %vm408_vm3, 1.0, %v1601_v26 }
  0xb4   : > { %1522 = vmatprep.mubr.msk.f32.mxu0 %vm455_vm0, %v1342_v59 }
  0xb5   : > { %1523 = vmatmul.mubr.msk.f32.vlgmr.msra.gmra.mrb[8].mxu0 %vm455_vm0, %v1343_v60  ;;  %v373_v61 = vpop.permute.xlu0 %372 }
  0xb6   : > { %v268_v62 = vpop.permute.xlu1 %267  ;;  %vm411_vm9 = vcmp.eq.s32.totalorder %v1677_v23, %v373_v61 }
  0xb7   : > { %vm312_vm4 = vcmp.eq.s32.totalorder %v1677_v23, %v268_v62  ;;  %v1346_v11 = vsel %vm411_vm9, 1.0, %v1601_v26 }
  0xb8   : > { %v1327_v3 = vsel %vm312_vm4, 1.0, %v1601_v26 }
  0xba   : > { %v271_v63 = vpop.permute.xlu1 %270  ;;  %v265_v1 = vpop.permute.xlu0 %264 }
  0xbb   : > { %vm313_vm5 = vcmp.eq.s32.totalorder %v1677_v23, %v271_v63  ;;  %vm311_vm6 = vcmp.eq.s32.totalorder %v1677_v23, %v265_v1 }
  0xbc   : > { %v1326_v2 = vsel %vm311_vm6, 1.0, %v1601_v26  ;;  %v1328_v4 = vsel %vm313_vm5, 1.0, %v1601_v26 }
  0xbd   : > { %1494 = vmatprep.mubr.msk.f32.mxu1 %vm455_vm0, %v1326_v2 }
  0xbe   : > { %1495 = vmatmul.mubr.msk.f32.vlgmr.msra.gmra.mrb[8].mxu1 %vm455_vm0, %v1327_v3  ;;  %v274_v5 = vpop.permute.xlu0 %273 }
  0xbf   : > { %v367_v6 = vpop.permute.xlu1 %366  ;;  %1497 = vmatprep.mubr.msk.f32.mxu1 %vm455_vm0, %v1328_v4  ;;  %vm314_vm7 = vcmp.eq.s32.totalorder %v1677_v23, %v274_v5 }
  0xc0   : > { %vm409_vm8 = vcmp.eq.s32.totalorder %v1677_v23, %v367_v6  ;;  %v1329_v7 = vsel %vm314_vm7, 1.0, %v1601_v26 }
  0xc1   : > { %v1344_v8 = vsel %vm409_vm8, 1.0, %v1601_v26 }
  0xc2   : > { %1498 = vmatmul.mubr.msk.f32.gmra.mrb[10].mxu1 %vm455_vm0, %v1329_v7  ;;  %1525 = vmatprep.mubr.msk.f32.mxu0 %vm455_vm0, %v1344_v8  ;;  %v283_v9 = vpop.permute.xlu0 %282 }
  0xc3   : > { %v370_v10 = vpop.permute.xlu1 %369  ;;  %vm317_vm12 = vcmp.eq.s32.totalorder %v1677_v23, %v283_v9 }
  0xc4   : > { %vm410_vm10 = vcmp.eq.s32.totalorder %v1677_v23, %v370_v10  ;;  %v1332_v18 = vsel %vm317_vm12, 1.0, %v1601_v26 }
  0xc5   : > { %v1345_v12 = vsel %vm410_vm10, 1.0, %v1601_v26 }
  0xc6   : > { %1526 = vmatmul.mubr.msk.f32.gmra.mrb[10].mxu0 %vm455_vm0, %v1345_v12  ;;  %v292_v13 = vpop.permute.xlu0 %291 }
  0xc7   : > { %1528 = vmatprep.mubr.msk.f32.mxu0 %vm455_vm0, %v1346_v11  ;;  %vm320_vm3 = vcmp.eq.s32.totalorder %v1677_v23, %v292_v13 }
  0xc8   : > { %v277_v14 = vpop.permute.xlu1 %276  ;;  %v1335_v32 = vsel %vm320_vm3, 1.0, %v1601_v26 }
  0xc9   : > { %vm315_vm11 = vcmp.eq.s32.totalorder %v1677_v23, %v277_v14 }
  0xca   : > { %v1330_v15 = vsel %vm315_vm11, 1.0, %v1601_v26  ;;  %v301_v17 = vpop.permute.xlu0 %300 }
  0xcb   : > { %1500 = vmatprep.mubr.msk.f32.mxu1 %vm455_vm0, %v1330_v15  ;;  %vm323_vm9 = vcmp.eq.s32.totalorder %v1677_v23, %v301_v17 }
  0xcc   : > { %v280_v16 = vpop.permute.xlu1 %279  ;;  %v1338_v43 = vsel %vm323_vm9, 1.0, %v1601_v26 }
  0xcd   : > { %vm316_vm13 = vcmp.eq.s32.totalorder %v1677_v23, %v280_v16 }
  0xce   : > { %v1331_v19 = vsel %vm316_vm13, 1.0, %v1601_v26 }
  0xcf   : > { %1501 = vmatmul.mubr.msk.f32.gmra.mrb[12].mxu1 %vm455_vm0, %v1331_v19  ;;  %v382_v20 = vpop.permute.xlu0 %381 }
  0xd0   : > { %1503 = vmatprep.mubr.msk.f32.mxu1 %vm455_vm0, %v1332_v18  ;;  %vm414_vm15 = vcmp.eq.s32.totalorder %v1677_v23, %v382_v20 }
  0xd1   : > { %v376_v21 = vpop.permute.xlu1 %375  ;;  %v1349_v25 = vsel %vm414_vm15, 1.0, %v1601_v26 }
  0xd2   : > { %vm412_vm14 = vcmp.eq.s32.totalorder %v1677_v23, %v376_v21 }
  0xd3   : > { %v1347_v22 = vsel %vm412_vm14, 1.0, %v1601_v26  ;;  %v391_v34 = vpop.permute.xlu0 %390 }
  0xd4   : > { %1529 = vmatmul.mubr.msk.f32.gmra.mrb[12].mxu0 %vm455_vm0, %v1347_v22  ;;  %vm417_vm6 = vcmp.eq.s32.totalorder %v1677_v23, %v391_v34 }
  0xd5   : > { %v379_v24 = vpop.permute.xlu1 %378  ;;  %v1352_v37 = vsel %vm417_vm6, 1.0, %v1601_v26 }
  0xd6   : > { %vm413_vm1 = vcmp.eq.s32.totalorder %v1677_v23, %v379_v24 }
  0xd7   : > { %v1348_v27 = vsel %vm413_vm1, 1.0, %v1601_v26  ;;  %v400_v45 = vpop.permute.xlu0 %399 }
  0xd8   : > { %1531 = vmatprep.mubr.msk.f32.mxu0 %vm455_vm0, %v1348_v27  ;;  %vm420_vm12 = vcmp.eq.s32.totalorder %v1677_v23, %v400_v45 }
  0xd9   : > { %1532 = vmatmul.mubr.msk.f32.gmra.mrb[14].mxu0 %vm455_vm0, %v1349_v25  ;;  %v1355_v49 = vsel %vm420_vm12, 1.0, %v1601_v26 }
  0xda   : > { %v286_v28 = vpop.permute.xlu1 %285 }
  0xdb   : > { %vm318_vm2 = vcmp.eq.s32.totalorder %v1677_v23, %v286_v28 }
  0xdc   : > { %v1333_v29 = vsel %vm318_vm2, 1.0, %v1601_v26  ;;  %v310_v50 = vpop.permute.xlu0 %309 }
  0xdd   : > { %1504 = vmatmul.mubr.msk.f32.gmra.mrb[14].mxu1 %vm455_vm0, %v1333_v29  ;;  %vm326_vm15 = vcmp.eq.s32.totalorder %v1677_v23, %v310_v50 }
  0xde   : > { %v289_v30 = vpop.permute.xlu1 %288  ;;  %v1341_v54 = vsel %vm326_vm15, 1.0, %v1601_v26 }
  0xdf   : > { %vm319_vm4 = vcmp.eq.s32.totalorder %v1677_v23, %v289_v30 }
  0xe0   : > { %v1334_v31 = vsel %vm319_vm4, 1.0, %v1601_v26  ;;  %vm1228_vm4 = vcmask 7168  }
  0xe1   : > { %1506 = vmatprep.mubr.msk.f32.mxu1 %vm455_vm0, %v1334_v31 }
  0xe2   : > { %1507 = vmatmul.mubr.msk.f32.gmra.mrb[16].mxu1 %vm455_vm0, %v1335_v32 }
  0xe3   : > { %v385_v33 = vpop.permute.xlu1 %384 }
  0xe4   : > { %vm415_vm5 = vcmp.eq.s32.totalorder %v1677_v23, %v385_v33 }
  0xe5   : > { %v1350_v35 = vsel %vm415_vm5, 1.0, %v1601_v26 }
  0xe6   : > { %1534 = vmatprep.mubr.msk.f32.mxu0 %vm455_vm0, %v1350_v35 }
  0xe7   : > { %v388_v36 = vpop.permute.xlu1 %387 }
  0xe8   : > { %vm416_vm7 = vcmp.eq.s32.totalorder %v1677_v23, %v388_v36 }
  0xe9   : > { %v1351_v38 = vsel %vm416_vm7, 1.0, %v1601_v26 }
  0xea   : > { %1535 = vmatmul.mubr.msk.f32.gmra.mrb[16].mxu0 %vm455_vm0, %v1351_v38 }
  0xeb   : > { %1537 = vmatprep.mubr.msk.f32.mxu0 %vm455_vm0, %v1352_v37 }
  0xec   : > { %v295_v39 = vpop.permute.xlu1 %294 }
  0xed   : > { %vm321_vm8 = vcmp.eq.s32.totalorder %v1677_v23, %v295_v39 }
  0xee   : > { %v1336_v40 = vsel %vm321_vm8, 1.0, %v1601_v26 }
  0xef   : > { %1509 = vmatprep.mubr.msk.f32.mxu1 %vm455_vm0, %v1336_v40 }
  0xf0   : > { %v298_v41 = vpop.permute.xlu1 %297 }
  0xf1   : > { %vm322_vm10 = vcmp.eq.s32.totalorder %v1677_v23, %v298_v41 }
  0xf2   : > { %v1337_v42 = vsel %vm322_vm10, 1.0, %v1601_v26 }
  0xf3   : > { %1510 = vmatmul.mubr.msk.f32.gmra.mrb[18].mxu1 %vm455_vm0, %v1337_v42 }
  0xf4   : > { %1512 = vmatprep.mubr.msk.f32.mxu1 %vm455_vm0, %v1338_v43 }
  0xf5   : > { %v394_v44 = vpop.permute.xlu1 %393 }
  0xf6   : > { %vm418_vm11 = vcmp.eq.s32.totalorder %v1677_v23, %v394_v44 }
  0xf7   : > { %v1353_v46 = vsel %vm418_vm11, 1.0, %v1601_v26 }
  0xf8   : > { %1538 = vmatmul.mubr.msk.f32.gmra.mrb[18].mxu0 %vm455_vm0, %v1353_v46 }
  0xf9   : > { %v397_v47 = vpop.permute.xlu1 %396 }
  0xfa   : > { %vm419_vm13 = vcmp.eq.s32.totalorder %v1677_v23, %v397_v47 }
  0xfb   : > { %v1354_v48 = vsel %vm419_vm13, 1.0, %v1601_v26 }
  0xfc   : > { %1540 = vmatprep.mubr.msk.f32.mxu0 %vm455_vm0, %v1354_v48 }
  0xfd   : > { %1541 = vmatmul.mubr.msk.f32.gmra.mrb[20].mxu0 %vm455_vm0, %v1355_v49 }
  0xfe   : > { %v304_v51 = vpop.permute.xlu1 %303 }
  0xff   : > { %vm324_vm14 = vcmp.eq.s32.totalorder %v1677_v23, %v304_v51 }
 0x100   : > { %v1339_v52 = vsel %vm324_vm14, 1.0, %v1601_v26 }
 0x101   : > { %1513 = vmatmul.mubr.msk.f32.gmra.mrb[20].mxu1 %vm455_vm0, %v1339_v52 }
 0x102   : > { %v307_v53 = vpop.permute.xlu1 %306 }
 0x103   : > { %vm325_vm1 = vcmp.eq.s32.totalorder %v1677_v23, %v307_v53 }
 0x104   : > { %v1340_v55 = vsel %vm325_vm1, 1.0, %v1601_v26 }
 0x105   : > { %1515 = vmatprep.mubr.msk.f32.mxu1 %vm455_vm0, %v1340_v55 }
 0x106   : > { %1516 = vmatmul.mubr.msk.f32.gmra.mrb[22].mxu1 %vm455_vm0, %v1341_v54 }
 0x107   : > { %v403_v56 = vpop.permute.xlu1 %402 }
 0x108   : > { %vm421_vm2 = vcmp.eq.s32.totalorder %v1677_v23, %v403_v56 }
 0x109   : > { %v1356_v57 = vsel %vm421_vm2, 1.0, %v1601_v26 }
 0x10a   : > { %1543 = vmatprep.mubr.msk.f32.mxu0 %vm455_vm0, %v1356_v57 }
 0x10b   : > { %v406_v58 = vpop.permute.xlu1 %405 }
 0x10c   : > { %vm422_vm3 = vcmp.eq.s32.totalorder %v1677_v23, %v406_v58 }
 0x10d   : > { %v1357_v59 = vsel %vm422_vm3, 1.0, %v1601_v26 }
 0x10e   : > { %1544 = vmatmul.mubr.msk.f32.gmra.mrb[22].mxu0 %vm455_vm0, %v1357_v59  ;;  %vm1083_vm0 = vcmask 261120  }
 0x167   : > { %v1468_v60 = vpop.f32.mrb[0].mxu0 }
 0x168   : > { %v570_v61 = vpop.f32.mrb[1].mxu0 }
 0x16b   : > { %v1825_v62 = vpop.f32.mrb[0].mxu1 }
 0x16c   : > { %v1827_v63 = vpop.f32.mrb[1].mxu1 }
 0x172   : > { %v1829_v1 = vpop.f32.mrb[2].mxu1  ;;  %v1471_v2 = vpop.f32.mrb[2].mxu0 }
 0x173   : > { %v1831_v3 = vpop.f32.mrb[3].mxu1  ;;  %v580_v4 = vpop.f32.mrb[3].mxu0 }
 0x17a   : > { %v1474_v5 = vpop.f32.mrb[4].mxu0  ;;  %v1833_v6 = vpop.f32.mrb[4].mxu1 }
 0x17b   : > { %v590_v23 = vpop.f32.mrb[5].mxu0  ;;  %v1835_v7 = vpop.f32.mrb[5].mxu1 }
 0x182   : > { %v1837_v26 = vpop.f32.mrb[6].mxu0  ;;  %v1839_v8 = vpop.f32.mrb[6].mxu1 }
 0x183   : > { %v1841_v9 = vpop.f32.mrb[7].mxu0  ;;  %v1843_v10 = vpop.f32.mrb[7].mxu1 }
 0x188   : > { %v1524_v11 = vpop.f32.mrb[8].mxu0 }
 0x189   : > { %v1052_v12 = vsub.f32 %v1468_v60, %v1524_v11  ;;  %v956_v13 = vpop.f32.mrb[9].mxu0 }
 0x18a   : > { %v1051_v14 = vsub.f32 %v570_v61, %v956_v13 }
 0x18b   : > { %v1133_v15 = vmul.f32 %v1052_v12, %v1052_v12 }
 0x18c   : > { %v1132_v25 = vmul.f32 %v1051_v14, %v1051_v14 }
 0x18d   : > { %v1151_v16 = vsel %vm1083_vm0, %v1133_v15, 0.0 }
 0x18e   : > { %1152 = vadd.xlane.f32.xlu1 %v1151_v16  ;;  %v1148_v37 = vsel %vm1083_vm0, %v1132_v25, 0.0 }
 0x191   : > { %v1496_v17 = vpop.f32.mrb[8].mxu1 }
 0x192   : > { %v1036_v18 = vsub.f32 %v1468_v60, %v1496_v17  ;;  %v763_v19 = vpop.f32.mrb[9].mxu1 }
 0x193   : > { %v1035_v20 = vsub.f32 %v570_v61, %v763_v19 }
 0x194   : > { %v1068_v21 = vmul.f32 %v1036_v18, %v1036_v18 }
 0x195   : > { %v1067_v22 = vmul.f32 %v1035_v20, %v1035_v20  ;;  %v1499_v24 = vpop.f32.mrb[10].mxu1 }
 0x196   : > { %v1038_v27 = vsub.f32 %v1471_v2, %v1499_v24  ;;  %v773_v28 = vpop.f32.mrb[11].mxu1  ;;  %v1087_v29 = vsel %vm1083_vm0, %v1068_v21, 0.0 }
 0x197   : > { %v1037_v30 = vsub.f32 %v580_v4, %v773_v28  ;;  %1088 = vadd.xlane.f32.xlu0 %v1087_v29  ;;  %v1084_v31 = vsel %vm1083_vm0, %v1067_v22, 0.0 }
 0x198   : > { %v1070_v32 = vmul.f32 %v1038_v27, %v1038_v27  ;;  %1085 = vadd.xlane.f32.xlu1 %v1084_v31 }
 0x199   : > { %v1527_v33 = vpop.f32.mrb[10].mxu0  ;;  %v1069_v34 = vmul.f32 %v1037_v30, %v1037_v30 }
 0x19a   : > { %v1054_v35 = vsub.f32 %v1471_v2, %v1527_v33  ;;  %v966_v36 = vpop.f32.mrb[11].mxu0  ;;  %v1093_v38 = vsel %vm1083_vm0, %v1070_v32, 0.0 }
 0x19b   : > { %v1053_v39 = vsub.f32 %v580_v4, %v966_v36  ;;  %1149 = vadd.xlane.f32.xlu0 %v1148_v37  ;;  %v1090_v42 = vsel %vm1083_vm0, %v1069_v34, 0.0 }
 0x19c   : > { %v1135_v40 = vmul.f32 %v1054_v35, %v1054_v35  ;;  %1094 = vadd.xlane.f32.xlu1 %v1093_v38 }
 0x19d   : > { %v1134_v41 = vmul.f32 %v1053_v39, %v1053_v39 }
 0x19e   : > { %v1157_v43 = vsel %vm1083_vm0, %v1135_v40, 0.0 }
 0x19f   : > { %1091 = vadd.xlane.f32.xlu0 %v1090_v42  ;;  %v1154_v45 = vsel %vm1083_vm0, %v1134_v41, 0.0 }
 0x1a0   : > { %1158 = vadd.xlane.f32.xlu1 %v1157_v43 }
 0x1a2   : > { %v1502_v44 = vpop.f32.mrb[12].mxu1 }
 0x1a3   : > { %v1040_v46 = vsub.f32 %v1474_v5, %v1502_v44  ;;  %1155 = vadd.xlane.f32.xlu0 %v1154_v45  ;;  %v783_v47 = vpop.f32.mrb[13].mxu1 }
 0x1a4   : > { %v1039_v48 = vsub.f32 %v590_v23, %v783_v47 }
 0x1a5   : > { %v1072_v49 = vmul.f32 %v1040_v46, %v1040_v46 }
 0x1a6   : > { %v1071_v50 = vmul.f32 %v1039_v48, %v1039_v48 }
 0x1a7   : > { %v1530_v51 = vpop.f32.mrb[12].mxu0  ;;  %v1099_v52 = vsel %vm1083_vm0, %v1072_v49, 0.0 }
 0x1a8   : > { %v1056_v53 = vsub.f32 %v1474_v5, %v1530_v51  ;;  %v976_v54 = vpop.f32.mrb[13].mxu0  ;;  %1100 = vadd.xlane.f32.xlu1 %v1099_v52  ;;  %v1096_v55 = vsel %vm1083_vm0, %v1071_v50, 0.0 }
 0x1a9   : > { %v1055_v56 = vsub.f32 %v590_v23, %v976_v54  ;;  %1097 = vadd.xlane.f32.xlu0 %v1096_v55 }
 0x1aa   : > { %v1137_v57 = vmul.f32 %v1056_v53, %v1056_v53 }
 0x1ab   : > { %v1136_v58 = vmul.f32 %v1055_v56, %v1055_v56 }
 0x1ac   : > { %v1533_v59 = vpop.f32.mrb[14].mxu0  ;;  %v1163_v60 = vsel %vm1083_vm0, %v1137_v57, 0.0 }
 0x1ad   : > { %v1058_v61 = vsub.f32 %v1837_v26, %v1533_v59  ;;  %1164 = vadd.xlane.f32.xlu1 %v1163_v60  ;;  %v986_v2 = vpop.f32.mrb[15].mxu0  ;;  %v1160_v4 = vsel %vm1083_vm0, %v1136_v58, 0.0 }
 0x1ae   : > { %v1057_v11 = vsub.f32 %v1841_v9, %v986_v2  ;;  %1161 = vadd.xlane.f32.xlu0 %v1160_v4 }
 0x1af   : > { %v1139_v16 = vmul.f32 %v1058_v61, %v1058_v61 }
 0x1b0   : > { %v1505_v5 = vpop.f32.mrb[14].mxu1  ;;  %v1138_v19 = vmul.f32 %v1057_v11, %v1057_v11 }
 0x1b1   : > { %v1042_v12 = vsub.f32 %v1837_v26, %v1505_v5  ;;  %v793_v13 = vpop.f32.mrb[15].mxu1  ;;  %v1169_v25 = vsel %vm1083_vm0, %v1139_v16, 0.0 }
 0x1b2   : > { %v1041_v23 = vsub.f32 %v1841_v9, %v793_v13  ;;  %v1166_v27 = vsel %vm1083_vm0, %v1138_v19, 0.0 }
 0x1b3   : > { %v1074_v14 = vmul.f32 %v1042_v12, %v1042_v12 }
 0x1b4   : > { %v1073_v15 = vmul.f32 %v1041_v23, %v1041_v23 }
 0x1b5   : > { %v1508_v17 = vpop.f32.mrb[16].mxu1  ;;  %v1105_v18 = vsel %vm1083_vm0, %v1074_v14, 0.0 }
 0x1b6   : > { %v1044_v20 = vsub.f32 %v1825_v62, %v1508_v17  ;;  %1106 = vadd.xlane.f32.xlu1 %v1105_v18  ;;  %v803_v21 = vpop.f32.mrb[17].mxu1  ;;  %v1102_v22 = vsel %vm1083_vm0, %v1073_v15, 0.0 }
 0x1b7   : > { %v1043_v24 = vsub.f32 %v1827_v63, %v803_v21  ;;  %1103 = vadd.xlane.f32.xlu0 %v1102_v22 }
 0x1b8   : > { %v1076_v26 = vmul.f32 %v1044_v20, %v1044_v20 }
 0x1b9   : > { %v1075_v9 = vmul.f32 %v1043_v24, %v1043_v24 }
 0x1ba   : > { %1170 = vadd.xlane.f32.xlu1 %v1169_v25  ;;  %v1111_v29 = vsel %vm1083_vm0, %v1076_v26, 0.0 }
 0x1bb   : > { %1167 = vadd.xlane.f32.xlu0 %v1166_v27  ;;  %v1108_v32 = vsel %vm1083_vm0, %v1075_v9, 0.0 }
 0x1bd   : > { %v1536_v28 = vpop.f32.mrb[16].mxu0 }
 0x1be   : > { %v1060_v30 = vsub.f32 %v1825_v62, %v1536_v28  ;;  %1112 = vadd.xlane.f32.xlu1 %v1111_v29  ;;  %v996_v31 = vpop.f32.mrb[17].mxu0 }
 0x1bf   : > { %v1059_v33 = vsub.f32 %v1827_v63, %v996_v31  ;;  %1109 = vadd.xlane.f32.xlu0 %v1108_v32 }
 0x1c0   : > { %v1141_v34 = vmul.f32 %v1060_v30, %v1060_v30 }
 0x1c1   : > { %v1140_v35 = vmul.f32 %v1059_v33, %v1059_v33 }
 0x1c2   : > { %v1175_v36 = vsel %vm1083_vm0, %v1141_v34, 0.0 }
 0x1c3   : > { %1176 = vadd.xlane.f32.xlu1 %v1175_v36  ;;  %v1172_v37 = vsel %vm1083_vm0, %v1140_v35, 0.0 }
 0x1c4   : > { %1173 = vadd.xlane.f32.xlu0 %v1172_v37 }
 0x1c6   : > { %v1511_v38 = vpop.f32.mrb[18].mxu1 }
 0x1c7   : > { %v1046_v39 = vsub.f32 %v1829_v1, %v1511_v38  ;;  %v813_v40 = vpop.f32.mrb[19].mxu1 }
 0x1c8   : > { %v1045_v62 = vsub.f32 %v1831_v3, %v813_v40 }
 0x1c9   : > { %v1078_v41 = vmul.f32 %v1046_v39, %v1046_v39 }
 0x1ca   : > { %v1077_v42 = vmul.f32 %v1045_v62, %v1045_v62 }
 0x1cb   : > { %v1539_v43 = vpop.f32.mrb[18].mxu0  ;;  %v1117_v63 = vsel %vm1083_vm0, %v1078_v41, 0.0 }
 0x1cc   : > { %v1062_v44 = vsub.f32 %v1829_v1, %v1539_v43  ;;  %1118 = vadd.xlane.f32.xlu1 %v1117_v63  ;;  %v1006_v45 = vpop.f32.mrb[19].mxu0  ;;  %v1114_v46 = vsel %vm1083_vm0, %v1077_v42, 0.0 }
 0x1cd   : > { %v1061_v47 = vsub.f32 %v1831_v3, %v1006_v45  ;;  %1115 = vadd.xlane.f32.xlu0 %v1114_v46 }
 0x1ce   : > { %v1143_v48 = vmul.f32 %v1062_v44, %v1062_v44 }
 0x1cf   : > { %v1142_v49 = vmul.f32 %v1061_v47, %v1061_v47 }
 0x1d0   : > { %v1542_v50 = vpop.f32.mrb[20].mxu0  ;;  %v1181_v51 = vsel %vm1083_vm0, %v1143_v48, 0.0 }
 0x1d1   : > { %v1064_v52 = vsub.f32 %v1833_v6, %v1542_v50  ;;  %1182 = vadd.xlane.f32.xlu1 %v1181_v51  ;;  %v1016_v53 = vpop.f32.mrb[21].mxu0  ;;  %v1178_v54 = vsel %vm1083_vm0, %v1142_v49, 0.0 }
 0x1d2   : > { %v1063_v1 = vsub.f32 %v1835_v7, %v1016_v53  ;;  %1179 = vadd.xlane.f32.xlu0 %v1178_v54 }
 0x1d3   : > { %v1145_v60 = vmul.f32 %v1064_v52, %v1064_v52 }
 0x1d4   : > { %v1514_v55 = vpop.f32.mrb[20].mxu1  ;;  %v1144_v4 = vmul.f32 %v1063_v1, %v1063_v1 }
 0x1d5   : > { %v1048_v56 = vsub.f32 %v1833_v6, %v1514_v55  ;;  %v823_v57 = vpop.f32.mrb[21].mxu1  ;;  %v1187_v23 = vsel %vm1083_vm0, %v1145_v60, 0.0 }
 0x1d6   : > { %v1047_v3 = vsub.f32 %v1835_v7, %v823_v57  ;;  %v1184_v14 = vsel %vm1083_vm0, %v1144_v4, 0.0 }
 0x1d7   : > { %v1080_v58 = vmul.f32 %v1048_v56, %v1048_v56 }
 0x1d8   : > { %v1079_v59 = vmul.f32 %v1047_v3, %v1047_v3 }
 0x1d9   : > { %v1517_v61 = vpop.f32.mrb[22].mxu1  ;;  %v1123_v2 = vsel %vm1083_vm0, %v1080_v58, 0.0 }
 0x1da   : > { %v1050_v11 = vsub.f32 %v1839_v8, %v1517_v61  ;;  %1124 = vadd.xlane.f32.xlu1 %v1123_v2  ;;  %v833_v5 = vpop.f32.mrb[23].mxu1  ;;  %v1120_v12 = vsel %vm1083_vm0, %v1079_v59, 0.0 }
 0x1db   : > { %v1049_v13 = vsub.f32 %v1843_v10, %v833_v5  ;;  %1121 = vadd.xlane.f32.xlu0 %v1120_v12 }
 0x1dc   : > { %v1082_v6 = vmul.f32 %v1050_v11, %v1050_v11 }
 0x1dd   : > { %v1081_v7 = vmul.f32 %v1049_v13, %v1049_v13 }
 0x1de   : > { %1188 = vadd.xlane.f32.xlu1 %v1187_v23  ;;  %v1129_v16 = vsel %vm1083_vm0, %v1082_v6, 0.0 }
 0x1df   : > { %1185 = vadd.xlane.f32.xlu0 %v1184_v14  ;;  %v1126_v19 = vsel %vm1083_vm0, %v1081_v7, 0.0 }
 0x1e1   : > { %v1545_v15 = vpop.f32.mrb[22].mxu0 }
 0x1e2   : > { %v1066_v17 = vsub.f32 %v1839_v8, %v1545_v15  ;;  %v1026_v18 = vpop.f32.mrb[23].mxu0  ;;  %1130 = vadd.xlane.f32.xlu1 %v1129_v16 }
 0x1e3   : > { %v1065_v20 = vsub.f32 %v1843_v10, %v1026_v18  ;;  %1127 = vadd.xlane.f32.xlu0 %v1126_v19 }
 0x1e4   : > { %v1147_v21 = vmul.f32 %v1066_v17, %v1066_v17 }
 0x1e5   : > { %v1146_v22 = vmul.f32 %v1065_v20, %v1065_v20 }
 0x1e6   : > { %v1193_v24 = vsel %vm1083_vm0, %v1147_v21, 0.0 }
 0x1e7   : > { %1194 = vadd.xlane.f32.xlu1 %v1193_v24  ;;  %v1190_v26 = vsel %vm1083_vm0, %v1146_v22, 0.0 }
 0x1e8   : > { %1191 = vadd.xlane.f32.xlu0 %v1190_v26 }
 0x21b   : > { %v1153_v25 = vpop.xlane.xlu1 %1152 }
 0x224   : > { %v1089_v8 = vpop.xlane.xlu0 %1088 }
 0x225   : > { %vm1197_vm5 = vcmp.lt.f32.partialorder %v1089_v8, %v1153_v25  ;;  %v1086_v10 = vpop.xlane.xlu1 %1085 }
 0x226   : > { %v1213_v9 = vsel %vm1197_vm5, 1, %v1598_v0 }
 0x227   : > { %1230 = vst.msk [vmem:[%s1902_s22 + $0x8] sm:$0xff] %vm1228_vm4, %v1213_v9 }
 0x228   : > { %v1150_v27 = vpop.xlane.xlu0 %1149 }
 0x229   : > { %vm1196_vm6 = vcmp.lt.f32.partialorder %v1086_v10, %v1150_v27  ;;  %v1095_v28 = vpop.xlane.xlu1 %1094 }
 0x22a   : > { %v1212_v29 = vsel %vm1196_vm6, 1, %v1598_v0 }
 0x22b   : > { %1229 = vst.msk [vmem:[%s1902_s22] sm:$0xff] %vm1228_vm4, %v1212_v29 }
 0x22c   : > { %v1092_v30 = vpop.xlane.xlu0 %1091 }
 0x22d   : > { %v1159_v31 = vpop.xlane.xlu1 %1158 }
 0x22e   : > { %vm1199_vm7 = vcmp.lt.f32.partialorder %v1095_v28, %v1159_v31 }
 0x22f   : > { %v1215_v32 = vsel %vm1199_vm7, 1, %v1598_v0 }
 0x230   : > { %1232 = vst.msk [vmem:[%s1902_s22 + $0x18] sm:$0xff] %vm1228_vm4, %v1215_v32  ;;  %v1156_v33 = vpop.xlane.xlu0 %1155 }
 0x231   : > { %vm1198_vm8 = vcmp.lt.f32.partialorder %v1092_v30, %v1156_v33 }
 0x232   : > { %v1214_v34 = vsel %vm1198_vm8, 1, %v1598_v0 }
 0x233   : > { %1231 = vst.msk [vmem:[%s1902_s22 + $0x10] sm:$0xff] %vm1228_vm4, %v1214_v34 }
 0x235   : > { %v1101_v35 = vpop.xlane.xlu1 %1100 }
 0x236   : > { %v1098_v36 = vpop.xlane.xlu0 %1097 }
 0x23a   : > { %v1165_v37 = vpop.xlane.xlu1 %1164 }
 0x23b   : > { %vm1201_vm9 = vcmp.lt.f32.partialorder %v1101_v35, %v1165_v37  ;;  %v1162_v38 = vpop.xlane.xlu0 %1161 }
 0x23c   : > { %v1217_v39 = vsel %vm1201_vm9, 1, %v1598_v0  ;;  %vm1200_vm10 = vcmp.lt.f32.partialorder %v1098_v36, %v1162_v38 }
 0x23d   : > { %1234 = vst.msk [vmem:[%s1902_s22 + $0x28] sm:$0xff] %vm1228_vm4, %v1217_v39  ;;  %v1216_v40 = vsel %vm1200_vm10, 1, %v1598_v0 }
 0x23e   : > { %1233 = vst.msk [vmem:[%s1902_s22 + $0x20] sm:$0xff] %vm1228_vm4, %v1216_v40 }
 0x243   : > { %v1107_v62 = vpop.xlane.xlu1 %1106 }
 0x244   : > { %v1104_v41 = vpop.xlane.xlu0 %1103 }
 0x247   : > { %v1171_v42 = vpop.xlane.xlu1 %1170 }
 0x248   : > { %vm1203_vm11 = vcmp.lt.f32.partialorder %v1107_v62, %v1171_v42  ;;  %v1168_v43 = vpop.xlane.xlu0 %1167 }
 0x249   : > { %v1219_v63 = vsel %vm1203_vm11, 1, %v1598_v0  ;;  %vm1202_vm12 = vcmp.lt.f32.partialorder %v1104_v41, %v1168_v43 }
 0x24a   : > { %1236 = vst.msk [vmem:[%s1902_s22 + $0x38] sm:$0xff] %vm1228_vm4, %v1219_v63  ;;  %v1218_v44 = vsel %vm1202_vm12, 1, %v1598_v0 }
 0x24b   : > { %1235 = vst.msk [vmem:[%s1902_s22 + $0x30] sm:$0xff] %vm1228_vm4, %v1218_v44  ;;  %v1113_v45 = vpop.xlane.xlu1 %1112 }
 0x24c   : > { %v1110_v46 = vpop.xlane.xlu0 %1109 }
 0x250   : > { %v1177_v47 = vpop.xlane.xlu1 %1176 }
 0x251   : > { %vm1205_vm13 = vcmp.lt.f32.partialorder %v1113_v45, %v1177_v47  ;;  %v1174_v48 = vpop.xlane.xlu0 %1173 }
 0x252   : > { %v1221_v49 = vsel %vm1205_vm13, 1, %v1598_v0  ;;  %vm1204_vm14 = vcmp.lt.f32.partialorder %v1110_v46, %v1174_v48 }
 0x253   : > { %1238 = vst.msk [vmem:[%s1902_s22 + $0x48] sm:$0xff] %vm1228_vm4, %v1221_v49  ;;  %v1220_v50 = vsel %vm1204_vm14, 1, %v1598_v0 }
 0x254   : > { %1237 = vst.msk [vmem:[%s1902_s22 + $0x40] sm:$0xff] %vm1228_vm4, %v1220_v50 }
 0x259   : > { %v1119_v51 = vpop.xlane.xlu1 %1118 }
 0x25a   : > { %v1116_v52 = vpop.xlane.xlu0 %1115 }
 0x25e   : > { %v1183_v53 = vpop.xlane.xlu1 %1182 }
 0x25f   : > { %vm1207_vm15 = vcmp.lt.f32.partialorder %v1119_v51, %v1183_v53  ;;  %v1180_v54 = vpop.xlane.xlu0 %1179 }
 0x260   : > { %v1223_v1 = vsel %vm1207_vm15, 1, %v1598_v0  ;;  %vm1206_vm1 = vcmp.lt.f32.partialorder %v1116_v52, %v1180_v54 }
 0x261   : > { %1240 = vst.msk [vmem:[%s1902_s22 + $0x58] sm:$0xff] %vm1228_vm4, %v1223_v1  ;;  %v1222_v55 = vsel %vm1206_vm1, 1, %v1598_v0 }
 0x262   : > { %1239 = vst.msk [vmem:[%s1902_s22 + $0x50] sm:$0xff] %vm1228_vm4, %v1222_v55 }
 0x267   : > { %v1125_v56 = vpop.xlane.xlu1 %1124 }
 0x268   : > { %v1122_v57 = vpop.xlane.xlu0 %1121 }
 0x26b   : > { %v1189_v3 = vpop.xlane.xlu1 %1188 }
 0x26c   : > { %vm1209_vm2 = vcmp.lt.f32.partialorder %v1125_v56, %v1189_v3  ;;  %v1186_v58 = vpop.xlane.xlu0 %1185 }
 0x26d   : > { %v1225_v59 = vsel %vm1209_vm2, 1, %v1598_v0  ;;  %vm1208_vm3 = vcmp.lt.f32.partialorder %v1122_v57, %v1186_v58 }
 0x26e   : > { %1242 = vst.msk [vmem:[%s1902_s22 + $0x68] sm:$0xff] %vm1228_vm4, %v1225_v59  ;;  %v1224_v60 = vsel %vm1208_vm3, 1, %v1598_v0 }
 0x26f   : > { %1241 = vst.msk [vmem:[%s1902_s22 + $0x60] sm:$0xff] %vm1228_vm4, %v1224_v60  ;;  %v1131_v61 = vpop.xlane.xlu1 %1130 }
 0x270   : > { %v1128_v2 = vpop.xlane.xlu0 %1127 }
 0x274   : > { %v1195_v4 = vpop.xlane.xlu1 %1194 }
 0x275   : > { %vm1211_vm0 = vcmp.lt.f32.partialorder %v1131_v61, %v1195_v4  ;;  %v1192_v11 = vpop.xlane.xlu0 %1191 }
 0x276   : > { %v1227_v5 = vsel %vm1211_vm0, 1, %v1598_v0  ;;  %vm1210_vm5 = vcmp.lt.f32.partialorder %v1128_v2, %v1192_v11 }
 0x277   : > { %1244 = vst.msk [vmem:[%s1902_s22 + $0x78] sm:$0xff] %vm1228_vm4, %v1227_v5  ;;  %v1226_v12 = vsel %vm1210_vm5, 1, %v1598_v0 }
 0x278   : > { %1243 = vst.msk [vmem:[%s1902_s22 + $0x70] sm:$0xff] %vm1228_vm4, %v1226_v12 }
 0x279 PF: > { %s12_s9 = sadd.s32 1, %s1596_s9  }
 0x27a   : > { %p9_p4 = scmp.ge.s32.totalorder %s12_s9, 5  }
 0x27c   :  { %11 = sbr.rel (!%p9_p4) target bundleno = 1 (0x1), region = 58 }

</bundles_post_ra>
